<compile_context>
chip_gen: v7x
topology: tpu7x:2x2x1
jax: 0.10.0
libtpu: 0.0.40
codegen_flags: <defaults>
</compile_context>

<pallas_src>
import functools

import jax
import jax.numpy as jnp
from jax import lax
from jax.experimental import pallas as pl
from jax.experimental.pallas import tpu as pltpu

VMEM_LIMIT_BYTES = 32 * 1024 * 1024     # safe scoped-VMEM budget on v5e/v6e/v7x
X_RESIDENT_BYTES = 4 * 1024 * 1024      # keep x/h1 fully resident if it fits this


# ---------------------------------------------------------------------------
# Kernel: one fused GCN layer  out = activation(A_hat @ (x @ W) + b)
# ---------------------------------------------------------------------------
def gcn_layer_kernel(a_ref, x_ref, w_ref, b_ref, o_ref, acc_ref, *,
                     activation, tile_k, x_resident):
    """One (dst-tile i, src-tile k) step.

    grid = (num_dst_tiles, num_src_tiles); src axis is the reduction
    ("arbitrary", last). acc_ref is an f32 VMEM accumulator resident across it.
    """
    k = pl.program_id(1)

    @pl.when(k == 0)
    def _init():
        acc_ref[...] = jnp.zeros_like(acc_ref)

    if x_resident:
        # x is fully VMEM-resident (block index constant): slice out the k-panel.
        start = pl.multiple_of(k * tile_k, tile_k)
        x_blk = x_ref[pl.ds(start, tile_k), :]
    else:
        x_blk = x_ref[...]

    # Fused feature transform (small inner dim, W resident in VMEM), then the
    # dominant aggregation dot on the native bf16 MXU path with f32 accumulation.
    h = jnp.dot(x_blk, w_ref[...], preferred_element_type=jnp.float32)
    h = h.astype(jnp.bfloat16)
    acc_ref[...] += jnp.dot(a_ref[...], h, preferred_element_type=jnp.float32)

    @pl.when(k == pl.num_programs(1) - 1)
    def _finalize():
        out = acc_ref[...] + b_ref[...]          # bias folded into the epilogue only
        if activation == "relu":
            out = jnp.maximum(out, 0.0)
        elif activation == "log_softmax":
            # Padded class lanes of b carry -inf, so they drop out of the max /
            # logsumexp automatically (no per-step mask construction needed).
            m = jnp.max(out, axis=-1, keepdims=True)
            z = out - m
            out = z - jnp.log(jnp.sum(jnp.exp(z), axis=-1, keepdims=True))
        o_ref[...] = out.astype(o_ref.dtype)


# ---------------------------------------------------------------------------
# pallas_call wrapper for one layer
# ---------------------------------------------------------------------------
def _gcn_layer(a_bf16, x, w, b, *, activation, out_dtype, tile_m, tile_k):
    n_pad = a_bf16.shape[0]
    f_in = x.shape[1]
    f = w.shape[1]
    assert n_pad % tile_m == 0 and n_pad % tile_k == 0

    x_resident = n_pad * f_in * x.dtype.itemsize <= X_RESIDENT_BYTES
    if x_resident:
        x_spec = pl.BlockSpec((n_pad, f_in), lambda i, k: (0, 0))    # loaded once
    else:
        x_spec = pl.BlockSpec((tile_k, f_in), lambda i, k: (k, 0))   # streamed

    kernel = functools.partial(gcn_layer_kernel, activation=activation,
                               tile_k=tile_k, x_resident=x_resident)
    return pl.pallas_call(
        kernel,
        out_shape=jax.ShapeDtypeStruct((n_pad, f), out_dtype),
        grid_spec=pltpu.PrefetchScalarGridSpec(
            num_scalar_prefetch=0,
            grid=(n_pad // tile_m, n_pad // tile_k),
            in_specs=[
                pl.BlockSpec((tile_m, tile_k), lambda i, k: (i, k)),  # A_hat panel (bf16)
                x_spec,                                               # features
                pl.BlockSpec((f_in, f), lambda i, k: (0, 0)),         # weight (resident)
                pl.BlockSpec((1, f), lambda i, k: (0, 0)),            # bias (epilogue)
            ],
            out_specs=pl.BlockSpec((tile_m, f), lambda i, k: (i, 0)),
            scratch_shapes=[pltpu.VMEM((tile_m, f), jnp.float32)],
        ),
        compiler_params=pltpu.CompilerParams(
            dimension_semantics=("parallel", "arbitrary"),
            vmem_limit_bytes=VMEM_LIMIT_BYTES,
        ),
    )(a_bf16, x, w, b)


def _round_up(n, m):
    return (n + m - 1) // m * m


# ---------------------------------------------------------------------------
# Full 2-layer eval-mode forward
# ---------------------------------------------------------------------------
def gcn_forward(a_pad_bf16, x, w1, b1, w2, b2, *, num_nodes,
                tile_m=512, tile_k=512, hid_pad=128, out_pad=128):
    """a_pad_bf16: dense normalized adjacency, already zero-padded to (n_pad, n_pad)."""
    n_pad = a_pad_bf16.shape[0]
    in_c = x.shape[1]
    hid = w1.shape[1]
    out_c = w2.shape[1]

    tile_m = min(tile_m, n_pad)
    tile_k = min(tile_k, n_pad)

    # Zero-padding is exact: padded rows/cols/lanes contribute nothing to the
    # valid outputs (they are sliced off at the end).
    x_p = jnp.zeros((n_pad, in_c), jnp.float32).at[:num_nodes, :].set(x)
    w1_p = jnp.zeros((in_c, hid_pad), jnp.float32).at[:, :hid].set(w1)
    b1_p = jnp.zeros((1, hid_pad), jnp.float32).at[:, :hid].set(b1)
    w2_p = jnp.zeros((hid_pad, out_pad), jnp.float32).at[:hid, :out_c].set(w2)
    # Pre-bake the class-lane mask: padded lanes of b2 are -inf so the epilogue
    # log_softmax ignores them without an iota/where.
    b2_p = jnp.full((1, out_pad), -jnp.inf, jnp.float32).at[:, :out_c].set(b2)

    # Layer 1: h1 = relu(A @ (x @ W1) + b1), stored bf16 (halves layer-2 traffic).
    h1 = _gcn_layer(a_pad_bf16, x_p, w1_p, b1_p,
                    activation="relu", out_dtype=jnp.bfloat16,
                    tile_m=tile_m, tile_k=tile_k)                  # [n_pad, 128] bf16

    # dropout(p=0.5, training=False) is the identity in eval mode -> no-op.

    # Layer 2: out = log_softmax(A @ (h1 @ W2) + b2) over the first out_c lanes.
    w2_bf = w2_p.astype(jnp.bfloat16)
    out = _gcn_layer(a_pad_bf16, h1, w2_bf, b2_p,
                     activation="log_softmax", out_dtype=jnp.float32,
                     tile_m=tile_m, tile_k=tile_k)                 # [n_pad, 128] f32

    return out[:num_nodes, :out_c]


# ---------------------------------------------------------------------------
# Graph preprocessing + reference
# ---------------------------------------------------------------------------
def build_normalized_adjacency_padded(edge_index, num_nodes, n_pad):
    """PyG gcn_norm (add_self_loops=False, unit weights), densified straight into
    the padded (n_pad, n_pad) buffer and cast once to bf16 (no second pad-copy).

    edge_index: int32 [2, E], row 0 = source, row 1 = target.
    A_hat[dst, src] = deg(dst)^-1/2 * deg(src)^-1/2.
    """
    src, dst = edge_index[0], edge_index[1]
    deg = jnp.zeros((num_nodes,), jnp.float32).at[dst].add(1.0)
    dinv = jnp.where(deg > 0, 1.0 / jnp.sqrt(jnp.maximum(deg, 1e-30)), 0.0)
    norm = dinv[src] * dinv[dst]
    a = jnp.zeros((n_pad, n_pad), jnp.float32).at[dst, src].add(norm)
    return a.astype(jnp.bfloat16)


def reference_forward(a_hat, x, w1, b1, w2, b2):
    h1 = jnp.maximum(a_hat @ (x @ w1) + b1, 0.0)
    h2 = a_hat @ (h1 @ w2) + b2
    return jax.nn.log_softmax(h2, axis=-1)


if __name__ == "__main__":
    # Small deterministic problem: N=256 nodes, in_channels=16, hidden=64, classes=4.
    # tile_m=tile_k=128 -> grid (2, 2): exercises accumulator + epilogue + parallel dst.
    N, E, IN_C, HID, OUT_C = 256, 1024, 16, 64, 4

    key = jax.random.PRNGKey(0)
    k_x, k_e, k_w1, k_b1, k_w2, k_b2 = jax.random.split(key, 6)

    x = jax.random.normal(k_x, (N, IN_C), jnp.float32)
    edge_index = jax.random.randint(k_e, (2, E), 0, N, jnp.int32)

    w1 = jax.random.normal(k_w1, (IN_C, HID), jnp.float32) * (1.0 / jnp.sqrt(IN_C))
    b1 = 0.01 * jax.random.normal(k_b1, (1, HID), jnp.float32)
    w2 = jax.random.normal(k_w2, (HID, OUT_C), jnp.float32) * (1.0 / jnp.sqrt(HID))
    b2 = 0.01 * jax.random.normal(k_b2, (1, OUT_C), jnp.float32)

    n_pad = _round_up(N, 128)
    # A_hat is rounded to bf16 once; the reference uses the same bf16-rounded values
    # so the comparison isolates the kernel's tiling / bf16-intermediate path.
    a_pad_bf16 = build_normalized_adjacency_padded(edge_index, N, n_pad)

    out = gcn_forward(a_pad_bf16, x, w1, b1, w2, b2, num_nodes=N,
                      tile_m=128, tile_k=128)
    out = jax.block_until_ready(out)

    ref = reference_forward(a_pad_bf16[:N, :N].astype(jnp.float32), x, w1, b1, w2, b2)
    assert out.shape == (N, OUT_C)
    assert bool(jnp.all(jnp.isfinite(out)))
    # bf16 intermediates (h1, hw) vs. the all-f32 reference -> relaxed tolerance.
    assert jnp.allclose(out, ref, atol=2e-2, rtol=2e-2), float(jnp.max(jnp.abs(out - ref)))

    print("KERNEL_OK")
</pallas_src>

<mosaic_0001>
module attributes {stable_mosaic.version = 11 : i64} {
  func.func @gcn_layer_kernel(%arg0: i32, %arg1: i32, %arg2: memref<128x128xbf16, #tpu.memory_space<vmem>>, %arg3: memref<256x16xf32, #tpu.memory_space<vmem>>, %arg4: memref<16x128xf32, #tpu.memory_space<vmem>>, %arg5: memref<1x128xf32, #tpu.memory_space<vmem>>, %arg6: memref<128x128xbf16, #tpu.memory_space<vmem>>, %arg7: memref<128x128xf32, #tpu.memory_space<vmem>>) attributes {dimension_semantics = [#tpu.dimension_semantics<parallel>, #tpu.dimension_semantics<arbitrary>], iteration_bounds = array<i64: 2, 2>, scalar_prefetch = 0 : i64, scratch_operands = 1 : i64, tpu.core_type = #tpu.core_type<tc>, window_params = [{transform_indices = @transform_0, window_bounds = array<i64: 128, 128>}, {pipeline_mode = #tpu.pipeline_mode<synchronous>, transform_indices = @transform_1, window_bounds = array<i64: 256, 16>}, {pipeline_mode = #tpu.pipeline_mode<synchronous>, transform_indices = @transform_2, window_bounds = array<i64: 16, 128>}, {pipeline_mode = #tpu.pipeline_mode<synchronous>, transform_indices = @transform_3, window_bounds = array<i64: 1, 128>}, {transform_indices = @transform_4, window_bounds = array<i64: 128, 128>}]} {
    %c0_i32 = arith.constant 0 : i32
    %0 = arith.cmpi eq, %arg1, %c0_i32 : i32
    %1 = arith.extui %0 : i1 to i32
    %c0_i32_0 = arith.constant 0 : i32
    %2 = arith.cmpi ne, %1, %c0_i32_0 : i32
    scf.if %2 {
      %cst_11 = arith.constant 0.000000e+00 : f32
      %18 = vector.broadcast %cst_11 : f32 to vector<128x128xf32>
      %c0_12 = arith.constant 0 : index
      %c0_13 = arith.constant 0 : index
      %19 = vector.load %arg7[%c0_12, %c0_13] : memref<128x128xf32, #tpu.memory_space<vmem>>, vector<128x128xf32>
      tpu.vector_store %arg7[%c0_12, %c0_13], %18 {strides = array<i32>} : memref<128x128xf32, #tpu.memory_space<vmem>>, vector<128x128xf32>,
    } else {
    }
    %c128_i32 = arith.constant 128 : i32
    %3 = arith.muli %arg1, %c128_i32 : i32
    %4 = tpu.assume_multiple %3, 128 : i32
    %5 = arith.index_cast %4 : i32 to index
    %c0 = arith.constant 0 : index
    %6 = vector.load %arg3[%5, %c0] : memref<256x16xf32, #tpu.memory_space<vmem>>, vector<128x16xf32>
    %c0_1 = arith.constant 0 : index
    %c0_2 = arith.constant 0 : index
    %7 = vector.load %arg4[%c0_1, %c0_2] : memref<16x128xf32, #tpu.memory_space<vmem>>, vector<16x128xf32>
    %cst = arith.constant dense<0.000000e+00> : vector<128x128xf32>
    %8 = tpu.matmul %6, %7, %cst {dimension_numbers = #tpu.dot_dimension_numbers<[1], [0], [0], [1], [0, 0, 1, 1], [], []>} : vector<128x16xf32>, vector<16x128xf32>, vector<128x128xf32> -> vector<128x128xf32>
    %9 = arith.truncf %8 : vector<128x128xf32> to vector<128x128xbf16>
    %c0_3 = arith.constant 0 : index
    %c0_4 = arith.constant 0 : index
    %10 = vector.load %arg7[%c0_3, %c0_4] : memref<128x128xf32, #tpu.memory_space<vmem>>, vector<128x128xf32>
    %c0_5 = arith.constant 0 : index
    %c0_6 = arith.constant 0 : index
    %11 = vector.load %arg2[%c0_5, %c0_6] : memref<128x128xbf16, #tpu.memory_space<vmem>>, vector<128x128xbf16>
    %cst_7 = arith.constant dense<0.000000e+00> : vector<128x128xf32>
    %12 = tpu.matmul %11, %9, %cst_7 {dimension_numbers = #tpu.dot_dimension_numbers<[1], [0], [0], [1], [0, 0, 1, 1], [], []>} : vector<128x128xbf16>, vector<128x128xbf16>, vector<128x128xf32> -> vector<128x128xf32>
    %13 = arith.addf %10, %12 : vector<128x128xf32>
    %c0_8 = arith.constant 0 : index
    %c0_9 = arith.constant 0 : index
    %14 = vector.load %arg7[%c0_8, %c0_9] : memref<128x128xf32, #tpu.memory_space<vmem>>, vector<128x128xf32>
    tpu.vector_store %arg7[%c0_8, %c0_9], %13 {strides = array<i32>} : memref<128x128xf32, #tpu.memory_space<vmem>>, vector<128x128xf32>,
    %c1_i32 = arith.constant 1 : i32
    %15 = arith.cmpi eq, %arg1, %c1_i32 : i32
    %16 = arith.extui %15 : i1 to i32
    %c0_i32_10 = arith.constant 0 : i32
    %17 = arith.cmpi ne, %16, %c0_i32_10 : i32
    scf.if %17 {
      %c0_11 = arith.constant 0 : index
      %c0_12 = arith.constant 0 : index
      %18 = vector.load %arg7[%c0_11, %c0_12] : memref<128x128xf32, #tpu.memory_space<vmem>>, vector<128x128xf32>
      %c0_13 = arith.constant 0 : index
      %c0_14 = arith.constant 0 : index
      %19 = vector.load %arg5[%c0_13, %c0_14] : memref<1x128xf32, #tpu.memory_space<vmem>>, vector<1x128xf32>
      %20 = vector.broadcast %19 : vector<1x128xf32> to vector<128x128xf32>
      %21 = arith.addf %18, %20 : vector<128x128xf32>
      %cst_15 = arith.constant 0.000000e+00 : f32
      %22 = vector.broadcast %cst_15 : f32 to vector<128x128xf32>
      %23 = arith.maximumf %21, %22 : vector<128x128xf32>
      %24 = arith.truncf %23 : vector<128x128xf32> to vector<128x128xbf16>
      %c0_16 = arith.constant 0 : index
      %c0_17 = arith.constant 0 : index
      %25 = vector.load %arg6[%c0_16, %c0_17] : memref<128x128xbf16, #tpu.memory_space<vmem>>, vector<128x128xbf16>
      tpu.vector_store %arg6[%c0_16, %c0_17], %24 {strides = array<i32>} : memref<128x128xbf16, #tpu.memory_space<vmem>>, vector<128x128xbf16>,
    } else {
    }
    return
  }
  func.func @transform_0(%arg0: i32, %arg1: i32) -> (i32, i32) {
    %c0_i32 = arith.constant 0 : i32
    return %arg0, %arg1 : i32, i32
  }
  func.func @transform_1(%arg0: i32, %arg1: i32) -> (i32, i32) {
    %c0_i32 = arith.constant 0 : i32
    %c0_i32_0 = arith.constant 0 : i32
    %c0_i32_1 = arith.constant 0 : i32
    return %c0_i32, %c0_i32_0 : i32, i32
  }
  func.func @transform_2(%arg0: i32, %arg1: i32) -> (i32, i32) {
    %c0_i32 = arith.constant 0 : i32
    %c0_i32_0 = arith.constant 0 : i32
    %c0_i32_1 = arith.constant 0 : i32
    return %c0_i32, %c0_i32_0 : i32, i32
  }
  func.func @transform_3(%arg0: i32, %arg1: i32) -> (i32, i32) {
    %c0_i32 = arith.constant 0 : i32
    %c0_i32_0 = arith.constant 0 : i32
    %c0_i32_1 = arith.constant 0 : i32
    return %c0_i32, %c0_i32_0 : i32, i32
  }
  func.func @transform_4(%arg0: i32, %arg1: i32) -> (i32, i32) {
    %c0_i32 = arith.constant 0 : i32
    %c0_i32_0 = arith.constant 0 : i32
    return %arg0, %c0_i32 : i32, i32
  }
}

</mosaic_0001>

<bundles_post_ra>
// kernel: tpu_custom_call.1
= control target key start
LH: loop header
LB: loop body
LE: loop exit
PB: predicated region body
PF: predicated region fallthrough
CT: control target
= control target key end

     0   :  { %9 = vsyncpa [#allocation5], 0  ;;  %s1743_s0 = inlined_call_operand.vmem [shape: bf16[256,256], index: 0, kind: input, shape index: {}]   ;;  %s1744_s1 = inlined_call_operand.vmem [shape: f32[256,16], index: 1, kind: input, shape index: {}]   ;;  %s1745_s2 = inlined_call_operand.vmem [shape: f32[16,128], index: 2, kind: input, shape index: {}]   ;;  %s1746_s3 = inlined_call_operand.vmem [shape: f32[1,128], index: 3, kind: input, shape index: {}]   ;;  %s1747_s4 = inlined_call_operand.hbm [shape: bf16[256,128], index: 4, kind: output, shape index: {}]  }
   0x1   :  { %11 = vsyncpa [#allocation5 + $0x1], 0  ;;  %s1482_s15 = smov 0   ;;  %s1484_s16 = smov 0  }
   0x2   :  { %s1486_s17 = smov 0   ;;  %s1488_s18 = smov 0  }
   0x3   :  { %s1490_s19 = smov 0   ;;  %s1492_s20 = smov 0  }
   0x4   :  { %s1494_s21 = smov 0   ;;  %s1496_s22 = smov 0  }
   0x5   :  { %s1498_s23 = smov 0   ;;  %s1500_s24 = smov 0  }
   0x6 LB: > { %s1004_s25 = sadd.s32 4294967295, %s1451_s24   ;;  %s1005_s26 = sadd.s32 4294967294, %s1451_s24   ;;  %s1451_s24 = sphi %s1500_s24, %s17_s24   ;;  %s1447_s23 = sphi %s1498_s23, %s1759_s23   ;;  %s1443_s22 = sphi %s1496_s22, %s1758_s22   ;;  %s1439_s21 = sphi %s1494_s21, %s1757_s21   ;;  %s1435_s20 = sphi %s1492_s20, %s1756_s20   ;;  %s1431_s19 = sphi %s1490_s19, %s1755_s19   ;;  %s1427_s18 = sphi %s1488_s18, %s1754_s18   ;;  %s1423_s17 = sphi %s1486_s17, %s1753_s17   ;;  %s1419_s16 = sphi %s1484_s16, %s1752_s16   ;;  %s1415_s15 = sphi %s1482_s15, %s1751_s15  }
   0x7   : > { %s26_s27 = sadd.s32 1, %s1443_s22  ;;  %s29_s28 = sadd.s32 1, %s1447_s23 }
   0x8   : > { %p27_p0 = scmp.ge.s32.totalorder %s26_s27, 2  ;;  %s38_s29 = sadd.s32 1, %s1431_s19 }
   0x9   : > { %p45_p1 = scmp.ne.s32.totalorder %s1431_s19, %s1427_s18  ;;  %p46_p2 = scmp.eq.s32.totalorder %s1451_s24, 0 }
   0xa   : > { %s1761_s27 = smov (%p27_p0, %s26_s27), 0  ;;  %s1763_s28 = smov (!%p27_p0, %s29_s28), %s1447_s23 }
   0xb   : > { %s34_s30 = ssub.s32 %s1443_s22, %s1761_s27  ;;  %p1545_p3 = por %p46_p2, %p45_p1 }
   0xc   : > { %p31_p4 = scmp.ge.s32.totalorder %s1763_s28, 2  ;;  %s127_s6 = sadd.s32 1, %s1423_s17 }
   0xd   : > { %p137_p5 = scmp.ne.s32.totalorder %s1423_s17, %s1419_s16  ;;  %p138_p6 = scmp.eq.s32.totalorder %s1004_s25, 3 }
   0xe   : > { %s1765_s28 = smov (%p31_p4, %s1763_s28), 0  ;;  %p143_p8 = scmp.ne.s32.totalorder %s1419_s16, %s1415_s15 }
   0xf   : > { %p1554_p7 = por %p138_p6, %p137_p5  ;;  %s33_s8 = ssub.s32 %s1447_s23, %s1765_s28 }
  0x10   : > { %p144_p9 = scmp.eq.s32.totalorder %s1005_s26, 3  ;;  %s35_s9 = sor.u32 %s34_s30, %s33_s8 }
  0x11   : > { %p125_p10 = scmp.eq.s32.totalorder %s33_s8, 0  ;;  %p36_p11 = scmp.eq.s32.totalorder %s35_s9, 0 }
  0x12   : > { %p1562_p12 = por %p144_p9, %p143_p8  ;;  %p1007_p13 = scmp.ge.s32.totalorder %s1451_s24, 4 }
  0x13   : > { %s1567_s11 = scalar_select %p125_p10, %s1423_s17, %s127_s6  }
  0x14   : > { %s1570_s12 = scalar_select %p36_p11, %s1431_s19, %s38_s29  }
  0x15   : > { %169 = sbr.rel (%p1007_p13) target bundleno = 44 (0x2c), region = 28 }
  0x1c   : > { %172 = sbr.rel (!%p1545_p3) target bundleno = 44 (0x2c), region = 32  ;;  %s174_s13 = sand.u32 (%p1545_p3), 1, %s1431_s19  }
  0x1d   : > { %s1064_s14 = sshll.u32 (%p1545_p3), %s1447_s23, 5  ;;  %s1008_s25 = sshll.u32 (%p1545_p3), %s174_s13, 6 }
  0x1e   : > { %s179_s26 = sadd.s32 (%p1545_p3), %s1443_s22, %s1064_s14  ;;  %s176_s29 = scalar_lea.vmem (%p1545_p3), [#allocation3], %s1008_s25 }
  0x1f   : > { %s1011_s30 = sshll.u32 (%p1545_p3), %s179_s26, 2 }
  0x20   : > { %s1581_s6 = scalar_lea.vmem (%p1545_p3), %s1743_s0, %s1011_s30 }
  0x21   : > { %v197_v0 = vld [vmem:[%s1581_s6] sm:$0xf] (%p1545_p3)  ;;  %v199_v1 = vld [vmem:[%s1581_s6 + $0x8] sm:$0xf] (%p1545_p3)  ;;  %v201_v2 = vld [vmem:[%s1581_s6 + $0x10] sm:$0xf] (%p1545_p3) }
  0x22   : > { %198 = vst [vmem:[%s176_s29] sm:$0xf] (%p1545_p3), %v197_v0  ;;  %200 = vst [vmem:[%s176_s29 + $0x4] sm:$0xf] (%p1545_p3), %v199_v1  ;;  %v203_v3 = vld [vmem:[%s1581_s6 + $0x18] sm:$0xf] (%p1545_p3) }
  0x23   : > { %202 = vst [vmem:[%s176_s29 + $0x8] sm:$0xf] %v201_v2  ;;  %v205_v4 = vld [vmem:[%s1581_s6 + $0x20] sm:$0xf]  ;;  %v207_v5 = vld [vmem:[%s1581_s6 + $0x28] sm:$0xf] }
  0x24   : > { %204 = vst [vmem:[%s176_s29 + $0xc] sm:$0xf] %v203_v3  ;;  %206 = vst [vmem:[%s176_s29 + $0x10] sm:$0xf] %v205_v4  ;;  %v209_v6 = vld [vmem:[%s1581_s6 + $0x30] sm:$0xf] }
  0x25   : > { %208 = vst [vmem:[%s176_s29 + $0x14] sm:$0xf] %v207_v5  ;;  %v211_v7 = vld [vmem:[%s1581_s6 + $0x38] sm:$0xf]  ;;  %v213_v8 = vld [vmem:[%s1581_s6 + $0x40] sm:$0xf] }
  0x26   : > { %210 = vst [vmem:[%s176_s29 + $0x18] sm:$0xf] %v209_v6  ;;  %212 = vst [vmem:[%s176_s29 + $0x1c] sm:$0xf] %v211_v7  ;;  %v215_v9 = vld [vmem:[%s1581_s6 + $0x48] sm:$0xf] }
  0x27   : > { %214 = vst [vmem:[%s176_s29 + $0x20] sm:$0xf] %v213_v8  ;;  %v217_v10 = vld [vmem:[%s1581_s6 + $0x50] sm:$0xf]  ;;  %v219_v11 = vld [vmem:[%s1581_s6 + $0x58] sm:$0xf] }
  0x28   : > { %216 = vst [vmem:[%s176_s29 + $0x24] sm:$0xf] %v215_v9  ;;  %218 = vst [vmem:[%s176_s29 + $0x28] sm:$0xf] %v217_v10  ;;  %v221_v12 = vld [vmem:[%s1581_s6 + $0x60] sm:$0xf] }
  0x29   : > { %220 = vst [vmem:[%s176_s29 + $0x2c] sm:$0xf] %v219_v11  ;;  %v223_v13 = vld [vmem:[%s1581_s6 + $0x68] sm:$0xf]  ;;  %v225_v14 = vld [vmem:[%s1581_s6 + $0x70] sm:$0xf] }
  0x2a   : > { %222 = vst [vmem:[%s176_s29 + $0x30] sm:$0xf] %v221_v12  ;;  %224 = vst [vmem:[%s176_s29 + $0x34] sm:$0xf] %v223_v13  ;;  %v227_v15 = vld [vmem:[%s1581_s6 + $0x78] sm:$0xf] }
  0x2b   : > { %226 = vst [vmem:[%s176_s29 + $0x38] sm:$0xf] %v225_v14  ;;  %228 = vst [vmem:[%s176_s29 + $0x3c] sm:$0xf] %v227_v15 }
  0x2c PF: > { %p1012_p0 = scmp.ge.s32.totalorder %s1451_s24, 1  ;;  %p282_p1 = scmp.lt.s32.totalorder %s1451_s24, 5 }
  0x2e   : > { %p283_p2 = pnand %p1012_p0, %p282_p1 }
  0x2f   : > { %s289_s5 = sand.u32 (!%p283_p2), 1, %s1427_s18   ;;  %s311_s13 = sand.u32 (!%p283_p2), 1, %s1419_s16  }
  0x30   : > { %286 = sbr.rel (%p283_p2) target bundleno = 591 (0x24f), region = 73  ;;  %s1013_s14 = sshll.u32 (!%p283_p2), %s289_s5, 6 }
  0x31   : > { %s1014_s25 = sshll.u32 (!%p283_p2), %s311_s13, 6  ;;  %s1605_s26 = scalar_lea.vmem (!%p283_p2), [#allocation3], %s1013_s14 }
  0x32   : > { %s1607_s30 = scalar_lea.vmem (!%p283_p2), [#allocation4], %s1014_s25  ;;  %p1015_p3 = scmp.ne.s32.totalorder (!%p283_p2), %s1435_s20, 0 }
  0x37   : > { %320 = sbr.rel (%p1015_p3) target bundleno = 64 (0x40), region = 81  ;;  %v1453_v16 = vmov (!%p1015_p3), 0.0  }
  0x38   : > { %321 = vst [vmem:[#allocation2] sm:$0xff] (!%p1015_p3), %v1453_v16  ;;  %322 = vst [vmem:[#allocation2 + $0x8] sm:$0xff] (!%p1015_p3), %v1453_v16 }
  0x39   : > { %323 = vst [vmem:[#allocation2 + $0x10] sm:$0xff] (!%p1015_p3), %v1453_v16  ;;  %324 = vst [vmem:[#allocation2 + $0x18] sm:$0xff] (!%p1015_p3), %v1453_v16 }
  0x3a   : > { %325 = vst [vmem:[#allocation2 + $0x20] sm:$0xff] (!%p1015_p3), %v1453_v16  ;;  %326 = vst [vmem:[#allocation2 + $0x28] sm:$0xff] (!%p1015_p3), %v1453_v16 }
  0x3b   : > { %327 = vst [vmem:[#allocation2 + $0x30] sm:$0xff] (!%p1015_p3), %v1453_v16  ;;  %328 = vst [vmem:[#allocation2 + $0x38] sm:$0xff] (!%p1015_p3), %v1453_v16 }
  0x3c   : > { %329 = vst [vmem:[#allocation2 + $0x40] sm:$0xff] (!%p1015_p3), %v1453_v16  ;;  %330 = vst [vmem:[#allocation2 + $0x48] sm:$0xff] (!%p1015_p3), %v1453_v16 }
  0x3d   : > { %331 = vst [vmem:[#allocation2 + $0x50] sm:$0xff] (!%p1015_p3), %v1453_v16  ;;  %332 = vst [vmem:[#allocation2 + $0x58] sm:$0xff] (!%p1015_p3), %v1453_v16 }
  0x3e   : > { %333 = vst [vmem:[#allocation2 + $0x60] sm:$0xff] %v1453_v16  ;;  %334 = vst [vmem:[#allocation2 + $0x68] sm:$0xff] %v1453_v16 }
  0x3f   : > { %335 = vst [vmem:[#allocation2 + $0x70] sm:$0xff] %v1453_v16  ;;  %336 = vst [vmem:[#allocation2 + $0x78] sm:$0xff] %v1453_v16 }
  0x40 PF: > { %v355_v17 = vld [vmem:[%s1745_s2] sm:$0xff]  ;;  %v356_v18 = vld [vmem:[%s1745_s2 + $0x8] sm:$0xff]  ;;  %s1016_s29 = sshll.u32 %s1435_s20, 7  ;;  %vm357_vm0 = vcmask 130048   ;;  %v1333_v36 = vld [vmem:[%s1605_s26 + $0x10] sm:$0xff]   ;;  %p1041_p4 = scmp.ne.s32.totalorder %s1435_s20, 1 }
  0x41   : > { %v1223_v19 = vpack.c.bf16 %v356_v18, %v355_v17  ;;  %s1620_s25 = scalar_lea.vmem %s1744_s1, %s1016_s29  ;;  %1211 = vmatprep.mubr.bf16.mxu1 %v1333_v36  ;;  %v1337_v37 = vld [vmem:[%s1605_s26] sm:$0xff]   ;;  %v1334_v62 = vld [vmem:[%s1605_s26 + $0x18] sm:$0xff]   ;;  %v1338_v63 = vld [vmem:[%s1605_s26 + $0x8] sm:$0xff]  }
  0x42   : > { %v339_v20 = vld [vmem:[%s1620_s25] sm:$0xff]  ;;  %v340_v21 = vld [vmem:[%s1620_s25 + $0x8] sm:$0xff]  ;;  %v341_v22 = vld [vmem:[%s1620_s25 + $0x10] sm:$0xff] }
  0x43   : > { %1224 = vmatprep.subr.bf16.mxu0 %v1223_v19  ;;  %1167 = vmatprep.mubr.msk.f32.mxu0 %vm357_vm0, %v339_v20  ;;  %v342_v23 = vld [vmem:[%s1620_s25 + $0x18] sm:$0xff]  ;;  %v343_v24 = vld [vmem:[%s1620_s25 + $0x20] sm:$0xff]  ;;  %v344_v25 = vld [vmem:[%s1620_s25 + $0x28] sm:$0xff] }
  0x44   : > { %1226 = vmatpush3.bf16.msra.mxu0 %v1223_v19  ;;  %v345_v26 = vld [vmem:[%s1620_s25 + $0x30] sm:$0xff]  ;;  %v346_v27 = vld [vmem:[%s1620_s25 + $0x38] sm:$0xff]  ;;  %v347_v28 = vld [vmem:[%s1620_s25 + $0x40] sm:$0xff] }
  0x45   : > { %v348_v29 = vld [vmem:[%s1620_s25 + $0x48] sm:$0xff]  ;;  %v349_v30 = vld [vmem:[%s1620_s25 + $0x50] sm:$0xff]  ;;  %v350_v31 = vld [vmem:[%s1620_s25 + $0x58] sm:$0xff] }
  0x46   : > { %v351_v32 = vld [vmem:[%s1620_s25 + $0x60] sm:$0xff]  ;;  %v352_v33 = vld [vmem:[%s1620_s25 + $0x68] sm:$0xff]  ;;  %v353_v34 = vld [vmem:[%s1620_s25 + $0x70] sm:$0xff] }
  0x47   : > { %1168 = vmatmul.mubr.msk.f32.vlgmr.msra.gmra.mrb[0].mxu0 %vm357_vm0, %v340_v21  ;;  %v354_v35 = vld [vmem:[%s1620_s25 + $0x78] sm:$0xff]  ;;  %v1335_v0 = vld [vmem:[%s1605_s26 + $0x20] sm:$0xff]   ;;  %v1336_v1 = vld [vmem:[%s1605_s26 + $0x28] sm:$0xff]  }
  0x48   : > { %1170 = vmatprep.mubr.msk.f32.mxu0 %vm357_vm0, %v341_v22  ;;  %v1339_v2 = vld [vmem:[%s1605_s26 + $0x30] sm:$0xff]   ;;  %v1340_v3 = vld [vmem:[%s1605_s26 + $0x38] sm:$0xff]   ;;  %v563_v6 = vld [vmem:[#allocation2 + $0x20] sm:$0xff] }
  0x49   : > { %v565_v4 = vld [vmem:[#allocation2 + $0x30] sm:$0xff]  ;;  %v559_v7 = vld [vmem:[#allocation2] sm:$0xff]  ;;  %v566_v9 = vld [vmem:[#allocation2 + $0x38] sm:$0xff] }
  0x4a   : > { %v561_v5 = vld [vmem:[#allocation2 + $0x10] sm:$0xff]  ;;  %v562_v11 = vld [vmem:[#allocation2 + $0x18] sm:$0xff]  ;;  %v564_v14 = vld [vmem:[#allocation2 + $0x28] sm:$0xff] }
  0x4b   : > { %1171 = vmatmul.mubr.msk.f32.gmra.mrb[2].mxu0 %vm357_vm0, %v342_v23  ;;  %v560_v17 = vld [vmem:[#allocation2 + $0x8] sm:$0xff] }
  0x4c   : > { %1173 = vmatprep.mubr.msk.f32.mxu0 %vm357_vm0, %v343_v24 }
  0x4f   : > { %1174 = vmatmul.mubr.msk.f32.gmra.mrb[4].mxu0 %vm357_vm0, %v344_v25 }
  0x50   : > { %1176 = vmatprep.mubr.msk.f32.mxu0 %vm357_vm0, %v345_v26 }
  0x53   : > { %1177 = vmatmul.mubr.msk.f32.gmra.mrb[6].mxu0 %vm357_vm0, %v346_v27 }
  0x54   : > { %1179 = vmatprep.mubr.msk.f32.mxu0 %vm357_vm0, %v347_v28  ;;  %v569_v28 = vld [vmem:[#allocation2 + $0x50] sm:$0xff] }
  0x57   : > { %1180 = vmatmul.mubr.msk.f32.gmra.mrb[8].mxu0 %vm357_vm0, %v348_v29  ;;  %v567_v29 = vld [vmem:[#allocation2 + $0x40] sm:$0xff] }
  0x58   : > { %1182 = vmatprep.mubr.msk.f32.mxu0 %vm357_vm0, %v349_v30 }
  0x5b   : > { %1183 = vmatmul.mubr.msk.f32.gmra.mrb[10].mxu0 %vm357_vm0, %v350_v31  ;;  %v570_v31 = vld [vmem:[#allocation2 + $0x58] sm:$0xff] }
  0x5c   : > { %1185 = vmatprep.mubr.msk.f32.mxu0 %vm357_vm0, %v351_v32 }
  0x5f   : > { %1186 = vmatmul.mubr.msk.f32.gmra.mrb[12].mxu0 %vm357_vm0, %v352_v33 }
  0x60   : > { %1188 = vmatprep.mubr.msk.f32.mxu0 %vm357_vm0, %v353_v34  ;;  %v568_v34 = vld [vmem:[#allocation2 + $0x48] sm:$0xff] }
  0x63   : > { %1189 = vmatmul.mubr.msk.f32.gmra.mrb[14].mxu0 %vm357_vm0, %v354_v35 }
  0x64   : > { %1207 = vmatprep.mubr.bf16.mxu0 %v1337_v37 }
 0x11a   : > { %v1169_v38 = vpop.f32.mrb[0].mxu0 }
 0x11b   : > { %v472_v39 = vpop.f32.mrb[1].mxu0 }
 0x11c   : > { %v551_v40 = vpack.c.bf16 %v1169_v38, %v472_v39 }
 0x11e   : > { %v1172_v41 = vpop.f32.mrb[2].mxu0  ;;  %1191 = vmatprep.subr.bf16.mxu0 %v551_v40  ;;  %1227 = vmatprep.subr.bf16.mxu1 %v551_v40 }
 0x11f   : > { %v482_v42 = vpop.f32.mrb[3].mxu0  ;;  %1192 = vmatpush3.bf16.msra.mxu0 %v551_v40  ;;  %1235 = vmatpush3.bf16.msra.mxu1 %v551_v40  ;;  %v573_v40 = vld [vmem:[#allocation2 + $0x70] sm:$0xff] }
 0x120   : > { %v552_v43 = vpack.c.bf16 %v1172_v41, %v482_v42  ;;  %v571_v41 = vld [vmem:[#allocation2 + $0x60] sm:$0xff] }
 0x122   : > { %v1175_v44 = vpop.f32.mrb[4].mxu0  ;;  %1193 = vmatprep.subr.bf16.mxu0 %v552_v43  ;;  %1228 = vmatprep.subr.bf16.mxu1 %v552_v43 }
 0x123   : > { %v492_v45 = vpop.f32.mrb[5].mxu0  ;;  %1194 = vmatpush3.bf16.msra.mxu0 %v552_v43  ;;  %1236 = vmatpush3.bf16.msra.mxu1 %v552_v43  ;;  %v574_v43 = vld [vmem:[#allocation2 + $0x78] sm:$0xff] }
 0x124   : > { %v553_v46 = vpack.c.bf16 %v1175_v44, %v492_v45 }
 0x126   : > { %v1178_v47 = vpop.f32.mrb[6].mxu0  ;;  %1195 = vmatprep.subr.bf16.mxu0 %v553_v46  ;;  %1229 = vmatprep.subr.bf16.mxu1 %v553_v46 }
 0x127   : > { %v502_v48 = vpop.f32.mrb[7].mxu0  ;;  %1196 = vmatpush3.bf16.msra.mxu0 %v553_v46  ;;  %1237 = vmatpush3.bf16.msra.mxu1 %v553_v46  ;;  %v572_v46 = vld [vmem:[#allocation2 + $0x68] sm:$0xff] }
 0x128   : > { %v554_v49 = vpack.c.bf16 %v1178_v47, %v502_v48 }
 0x12a   : > { %v1181_v50 = vpop.f32.mrb[8].mxu0  ;;  %1197 = vmatprep.subr.bf16.mxu0 %v554_v49  ;;  %1230 = vmatprep.subr.bf16.mxu1 %v554_v49 }
 0x12b   : > { %v512_v51 = vpop.f32.mrb[9].mxu0  ;;  %1198 = vmatpush3.bf16.msra.mxu0 %v554_v49  ;;  %1238 = vmatpush3.bf16.msra.mxu1 %v554_v49 }
 0x12c   : > { %v555_v52 = vpack.c.bf16 %v1181_v50, %v512_v51 }
 0x12e   : > { %v1184_v53 = vpop.f32.mrb[10].mxu0  ;;  %1199 = vmatprep.subr.bf16.mxu0 %v555_v52  ;;  %1231 = vmatprep.subr.bf16.mxu1 %v555_v52 }
 0x12f   : > { %v522_v54 = vpop.f32.mrb[11].mxu0  ;;  %1200 = vmatpush3.bf16.msra.mxu0 %v555_v52  ;;  %1239 = vmatpush3.bf16.msra.mxu1 %v555_v52 }
 0x130   : > { %v556_v55 = vpack.c.bf16 %v1184_v53, %v522_v54  ;;  %v1042_v54 = vld [vmem:[%s1746_s3] ss:$0 sm:$0xff] (!%p1041_p4) }
 0x132   : > { %v1187_v56 = vpop.f32.mrb[12].mxu0  ;;  %1201 = vmatprep.subr.bf16.mxu0 %v556_v55  ;;  %1232 = vmatprep.subr.bf16.mxu1 %v556_v55 }
 0x133   : > { %v532_v57 = vpop.f32.mrb[13].mxu0  ;;  %1202 = vmatpush3.bf16.msra.mxu0 %v556_v55  ;;  %1240 = vmatpush3.bf16.msra.mxu1 %v556_v55 }
 0x134   : > { %v557_v58 = vpack.c.bf16 %v1187_v56, %v532_v57 }
 0x136   : > { %v1190_v59 = vpop.f32.mrb[14].mxu0  ;;  %1203 = vmatprep.subr.bf16.mxu0 %v557_v58  ;;  %1233 = vmatprep.subr.bf16.mxu1 %v557_v58 }
 0x137   : > { %v542_v60 = vpop.f32.mrb[15].mxu0  ;;  %1204 = vmatpush3.bf16.msra.mxu0 %v557_v58  ;;  %1241 = vmatpush3.bf16.msra.mxu1 %v557_v58 }
 0x138   : > { %v558_v61 = vpack.c.bf16 %v1190_v59, %v542_v60 }
 0x13a   : > { %1205 = vmatprep.subr.bf16.mxu0 %v558_v61  ;;  %1234 = vmatprep.subr.bf16.mxu1 %v558_v61 }
 0x13b   : > { %1206 = vmatpush3.bf16.msra.mxu0 %v558_v61  ;;  %1242 = vmatpush3.bf16.msra.mxu1 %v558_v61 }
 0x13e   : > { %1212 = vmatmul.mubr.bf16.vlgmr.msra.gmra.mrb[0].mxu1 %v1334_v62  ;;  %1208 = vmatmul.mubr.bf16.vlgmr.msra.gmra.mrb[16].mxu0 %v1338_v63 }
 0x13f   : > { %1215 = vmatprep.mubr.bf16.mxu1 %v1335_v0 }
 0x146   : > { %1216 = vmatmul.mubr.bf16.gmra.mrb[4].mxu1 %v1336_v1 }
 0x147   : > { %1219 = vmatprep.mubr.bf16.mxu1 %v1339_v2 }
 0x14e   : > { %1220 = vmatmul.mubr.bf16.gmra.mrb[8].mxu1 %v1340_v3 }
 0x211   : > { %v1213_v8 = vpop.f32.mrb[0].mxu1  ;;  %v1209_v10 = vpop.f32.mrb[16].mxu0 }
 0x212   : > { %v742_v12 = vadd.f32 %v1213_v8, %v565_v4  ;;  %v689_v13 = vpop.f32.mrb[1].mxu1  ;;  %v738_v15 = vadd.f32 %v1209_v10, %v561_v5  ;;  %v673_v16 = vpop.f32.mrb[17].mxu0 }
 0x213   : > { %v740_v18 = vadd.f32 %v689_v13, %v563_v6  ;;  %v1214_v19 = vpop.f32.mrb[2].mxu1  ;;  %v736_v20 = vadd.f32 %v673_v16, %v559_v7  ;;  %v1210_v21 = vpop.f32.mrb[18].mxu0 }
 0x214   : > { %758 = vst [vmem:[#allocation2 + $0x30] sm:$0xff] %v742_v12  ;;  %v743_v22 = vadd.f32 %v1214_v19, %v566_v9  ;;  %v692_v23 = vpop.f32.mrb[3].mxu1  ;;  %754 = vst [vmem:[#allocation2 + $0x10] sm:$0xff] %v738_v15  ;;  %v739_v24 = vadd.f32 %v1210_v21, %v562_v11  ;;  %v676_v25 = vpop.f32.mrb[19].mxu0 }
 0x215   : > { %756 = vst [vmem:[#allocation2 + $0x20] sm:$0xff] %v740_v18  ;;  %v741_v26 = vadd.f32 %v692_v23, %v564_v14  ;;  %752 = vst [vmem:[#allocation2] sm:$0xff] %v736_v20  ;;  %v737_v27 = vadd.f32 %v676_v25, %v560_v17 }
 0x216   : > { %759 = vst [vmem:[#allocation2 + $0x38] sm:$0xff] %v743_v22  ;;  %755 = vst [vmem:[#allocation2 + $0x18] sm:$0xff] %v739_v24 }
 0x217   : > { %757 = vst [vmem:[#allocation2 + $0x28] sm:$0xff] %v741_v26  ;;  %753 = vst [vmem:[#allocation2 + $0x8] sm:$0xff] %v737_v27 }
 0x219   : > { %v1217_v30 = vpop.f32.mrb[4].mxu1 }
 0x21a   : > { %v746_v32 = vadd.f32 %v1217_v30, %v569_v28  ;;  %v705_v33 = vpop.f32.mrb[5].mxu1 }
 0x21b   : > { %v744_v35 = vadd.f32 %v705_v33, %v567_v29  ;;  %v1218_v36 = vpop.f32.mrb[6].mxu1  ;;  %v774_v57 = vld [vmem:[#allocation2 + $0x10] sm:$0xff] (!%p1041_p4) }
 0x21c   : > { %762 = vst [vmem:[#allocation2 + $0x50] sm:$0xff] %v746_v32  ;;  %v747_v37 = vadd.f32 %v1218_v36, %v570_v31  ;;  %v708_v38 = vpop.f32.mrb[7].mxu1  ;;  %v772_v52 = vld [vmem:[#allocation2] sm:$0xff] (!%p1041_p4)  ;;  %v797_v60 = vadd.f32 (!%p1041_p4), %v1042_v54, %v774_v57  ;;  %v778_v0 = vld [vmem:[#allocation2 + $0x30] sm:$0xff] (!%p1041_p4) }
 0x21d   : > { %760 = vst [vmem:[#allocation2 + $0x40] sm:$0xff] %v744_v35  ;;  %v745_v39 = vadd.f32 %v708_v38, %v568_v34  ;;  %v795_v55 = vadd.f32 (!%p1041_p4), %v1042_v54, %v772_v52  ;;  %v775_v58 = vld [vmem:[#allocation2 + $0x18] sm:$0xff] (!%p1041_p4)  ;;  %v776_v59 = vld [vmem:[#allocation2 + $0x20] sm:$0xff] (!%p1041_p4)  ;;  %v801_v5 = vadd.f32 (!%p1041_p4), %v1042_v54, %v778_v0 }
 0x21e   : > { %763 = vst [vmem:[#allocation2 + $0x58] sm:$0xff] %v747_v37  ;;  %v773_v53 = vld [vmem:[#allocation2 + $0x8] sm:$0xff] (!%p1041_p4)  ;;  %v798_v61 = vadd.f32 (!%p1041_p4), %v1042_v54, %v775_v58  ;;  %v799_v63 = vadd.f32 (!%p1041_p4), %v1042_v54, %v776_v59  ;;  %v779_v1 = vld [vmem:[#allocation2 + $0x38] sm:$0xff] (!%p1041_p4)  ;;  %v813_v9 = vmax.f32 (!%p1041_p4), %v797_v60, 0.0 }
 0x21f   : > { %761 = vst [vmem:[#allocation2 + $0x48] sm:$0xff] %v745_v39  ;;  %v796_v56 = vadd.f32 (!%p1041_p4), %v1042_v54, %v773_v53  ;;  %v777_v62 = vld [vmem:[#allocation2 + $0x28] sm:$0xff] (!%p1041_p4)  ;;  %v811_v2 = vmax.f32 (!%p1041_p4), %v795_v55, 0.0  ;;  %v802_v12 = vadd.f32 (!%p1041_p4), %v1042_v54, %v779_v1  ;;  %v817_v17 = vmax.f32 (!%p1041_p4), %v801_v5, 0.0 }
 0x220   : > { %v800_v4 = vadd.f32 (!%p1041_p4), %v1042_v54, %v777_v62  ;;  %v814_v10 = vmax.f32 (!%p1041_p4), %v798_v61, 0.0  ;;  %v815_v11 = vmax.f32 (!%p1041_p4), %v799_v63, 0.0 }
 0x221   : > { %v1221_v42 = vpop.f32.mrb[8].mxu1  ;;  %771 = sbr.rel (%p1041_p4) target bundleno = 566 (0x236), region = 85  ;;  %v812_v3 = vmax.f32 (!%p1041_p4), %v796_v56, 0.0  ;;  %v818_v21 = vmax.f32 (!%p1041_p4), %v802_v12, 0.0 }
 0x222   : > { %v750_v44 = vadd.f32 %v1221_v42, %v573_v40  ;;  %v721_v45 = vpop.f32.mrb[9].mxu1  ;;  %v816_v16 = vmax.f32 (!%p1041_p4), %v800_v4, 0.0  ;;  %v1090_v20 = vpack.c.bf16 (!%p1041_p4), %v814_v10, %v813_v9 }
 0x223   : > { %v748_v47 = vadd.f32 %v721_v45, %v571_v41  ;;  %v1222_v48 = vpop.f32.mrb[10].mxu1  ;;  %v782_v8 = vld [vmem:[#allocation2 + $0x50] sm:$0xff] (!%p1041_p4)  ;;  %v1085_v15 = vpack.c.bf16 (!%p1041_p4), %v812_v3, %v811_v2  ;;  %v1100_v30 = vpack.c.bf16 (!%p1041_p4), %v818_v21, %v817_v17 }
 0x224   : > { %766 = vst [vmem:[#allocation2 + $0x70] sm:$0xff] %v750_v44  ;;  %v751_v49 = vadd.f32 %v1222_v48, %v574_v43  ;;  %v724_v50 = vpop.f32.mrb[11].mxu1  ;;  %v780_v6 = vld [vmem:[#allocation2 + $0x40] sm:$0xff] (!%p1041_p4)  ;;  %v805_v23 = vadd.f32 (!%p1041_p4), %v1042_v54, %v782_v8  ;;  %v1095_v26 = vpack.c.bf16 (!%p1041_p4), %v816_v16, %v815_v11  ;;  %1122 = vst [vmem:[%s1607_s30 + $0x8] sm:$0xff] (!%p1041_p4), %v1090_v20  }
 0x225   : > { %764 = vst [vmem:[#allocation2 + $0x60] sm:$0xff] %v748_v47  ;;  %v749_v51 = vadd.f32 %v724_v50, %v572_v46  ;;  %v783_v13 = vld [vmem:[#allocation2 + $0x58] sm:$0xff] (!%p1041_p4)  ;;  %v803_v18 = vadd.f32 (!%p1041_p4), %v1042_v54, %v780_v6  ;;  %1086 = vst [vmem:[%s1607_s30] sm:$0xff] (!%p1041_p4), %v1085_v15  }
 0x226   : > { %767 = vst [vmem:[#allocation2 + $0x78] sm:$0xff] %v751_v49  ;;  %v781_v7 = vld [vmem:[#allocation2 + $0x48] sm:$0xff] (!%p1041_p4)  ;;  %v806_v28 = vadd.f32 (!%p1041_p4), %v1042_v54, %v783_v13  ;;  %v821_v32 = vmax.f32 (!%p1041_p4), %v805_v23, 0.0  ;;  %1123 = vst [vmem:[%s1607_s30 + $0x10] sm:$0xff] (!%p1041_p4), %v1095_v26  }
 0x227   : > { %765 = vst [vmem:[#allocation2 + $0x68] sm:$0xff] %v749_v51  ;;  %v804_v22 = vadd.f32 (!%p1041_p4), %v1042_v54, %v781_v7  ;;  %v819_v27 = vmax.f32 (!%p1041_p4), %v803_v18, 0.0  ;;  %1124 = vst [vmem:[%s1607_s30 + $0x18] sm:$0xff] (!%p1041_p4), %v1100_v30  }
 0x228   : > { %v822_v34 = vmax.f32 %v806_v28, 0.0 }
 0x229   : > { %v820_v31 = vmax.f32 %v804_v22, 0.0 }
 0x22a   : > { %v1110_v40 = vpack.c.bf16 %v822_v34, %v821_v32 }
 0x22b   : > { %v786_v24 = vld [vmem:[#allocation2 + $0x70] sm:$0xff]  ;;  %v1105_v38 = vpack.c.bf16 %v820_v31, %v819_v27 }
 0x22c   : > { %v784_v14 = vld [vmem:[#allocation2 + $0x60] sm:$0xff]  ;;  %v809_v36 = vadd.f32 %v1042_v54, %v786_v24  ;;  %1126 = vst [vmem:[%s1607_s30 + $0x28] sm:$0xff] %v1110_v40  }
 0x22d   : > { %v787_v25 = vld [vmem:[#allocation2 + $0x78] sm:$0xff]  ;;  %v807_v29 = vadd.f32 %v1042_v54, %v784_v14  ;;  %1125 = vst [vmem:[%s1607_s30 + $0x20] sm:$0xff] %v1105_v38  }
 0x22e   : > { %v785_v19 = vld [vmem:[#allocation2 + $0x68] sm:$0xff]  ;;  %v810_v37 = vadd.f32 %v1042_v54, %v787_v25  ;;  %v825_v41 = vmax.f32 %v809_v36, 0.0 }
 0x22f   : > { %v808_v33 = vadd.f32 %v1042_v54, %v785_v19  ;;  %v823_v35 = vmax.f32 %v807_v29, 0.0 }
 0x230   : > { %v826_v42 = vmax.f32 %v810_v37, 0.0 }
 0x231   : > { %v824_v39 = vmax.f32 %v808_v33, 0.0 }
 0x232   : > { %v1120_v44 = vpack.c.bf16 %v826_v42, %v825_v41 }
 0x233   : > { %v1115_v43 = vpack.c.bf16 %v824_v39, %v823_v35 }
 0x234   : > { %1128 = vst [vmem:[%s1607_s30 + $0x38] sm:$0xff] %v1120_v44  }
 0x235   : > { %1127 = vst [vmem:[%s1607_s30 + $0x30] sm:$0xff] %v1115_v43  }
 0x236 PF: > { %s1081_s20 = sshll.u32 %s1439_s21, 10  ;;  %s921_s29 = sshll.u32 %s1607_s30, 4  ;;  %s1681_s29 = int_to_ptr.vmem [resolvable:$true] %s921_s29 }
 0x237   : > { %s1678_s6 = scalar_lea.hbm %s1747_s4, %s1081_s20  ;;  %s1685_s5 = scalar_lea.sflag [#allocation5], %s311_s13 }
 0x238   : > { %s1341_s14 = scalar_lea.vmem %s1681_s29, 1024  ;;  %s1454_s21 = smov [#allocation4]  }
 0x239   : > { %p1342_p5 = scmp.ne.s32.totalorder %s1681_s29, %s1341_s14  ;;  %s1345_s25 = sshll.u32 %s1454_s21, 4  ;;  %s1346_s25 = int_to_ptr.vmem [resolvable:$false] %s1345_s25 }
 0x23a   : > { %s1347_s26 = scalar_lea.vmem %s1346_s25, 2048  ;;  %p1348_p9 = scmp.lt.s32.totalorder %s1681_s29, %s1346_s25 }
 0x23b   : > { %p1343_p6 = pnand %p1342_p5, %p1554_p7  ;;  %p1349_p10 = scmp.lt.s32.totalorder %s1347_s26, %s1341_s14 }
 0x23d   : > { %p1344_p8 = pneg %p1343_p6  ;;  %p1350_p11 = por %p1349_p10, %p1348_p9 }
 0x23f   : > { %p1351_p13 = pnand %p1350_p11, %p1344_p8 }
 0x241   : > { %1354 = shalt.err (!%p1351_p13)
}
 0x242   : > { %s1355_s13 = scalar_lea.hbm %s1678_s6, 1024  ;;  %s1359_s20 = scalar_lea.hbm %s1747_s4, 2048 }
 0x243   : > { %p1356_p0 = scmp.ne.s32.totalorder %s1678_s6, %s1355_s13  ;;  %p1360_p3 = scmp.lt.u32.totalorder %s1678_s6, %s1747_s4 }
 0x244   : > { %p1361_p4 = scmp.lt.u32.totalorder %s1359_s20, %s1355_s13  ;;  %p1363_p6 = scmp.lt.u32.totalorder %s1355_s13, %s1678_s6 }
 0x245   : > { %p1357_p1 = pnand %p1356_p0, %p1554_p7 }
 0x246   : > { %p1362_p5 = por %p1361_p4, %p1360_p3 }
 0x247   : > { %p1358_p2 = pneg %p1357_p1 }
 0x248   : > { %p1364_p8 = por %p1363_p6, %p1362_p5 }
 0x24a   : > { %p1365_p9 = pnand %p1364_p8, %p1358_p2 }
 0x24c   : > { %1368 = shalt.err (!%p1365_p9)
}
 0x24d   : > { %s1455_s14 = smov 64   ;;  %s1456_s21 = smov 4  }
 0x24e   : > { %1243 = dma.vmem_to_hbm [thread:$0]  (%p1554_p7), %s1681_s29, 1024, %s1678_s6, %s1685_s5, %s1455_s14, %s1455_s14, %s1456_s21  }
 0x24f PF: > { %p1249_p10 = scmp.ge.s32.totalorder %s1451_s24, 2  ;;  %s936_s25 = sand.u32 1, %s1415_s15  }
 0x250   : > { %s937_s26 = scalar_lea.sflag [#allocation5], %s936_s25 }
 0x251   : > { %p1246_p11 = pnand %p1249_p10, %p1562_p12 }
 0x253   : > { %1410 = dma.done.wait (!%p1246_p11), %s937_s26, 1024  }
 0x254   : > { %1412 = vsyncadd (!%p1246_p11), %s937_s26, 4294966272  ;;  %s17_s24 = sadd.s32 1, %s1451_s24   ;;  %s1751_s15 = smov %s1419_s16 }
 0x255   : > { %p14_p13 = scmp.ge.s32.totalorder %s17_s24, 6   ;;  %s1752_s16 = smov %s1423_s17 }
 0x256   : > { %s1753_s17 = smov %s1567_s11  ;;  %s1754_s18 = smov %s1431_s19 }
 0x257   : > { %s1755_s19 = smov %s1570_s12  ;;  %s1756_s20 = smov %s1443_s22 }
 0x258   : > { %s1757_s21 = smov %s1447_s23  ;;  %s1758_s22 = smov %s1761_s27 }
 0x259   : > { %s1759_s23 = smov %s1765_s28  ;;  %16 = sbr.rel (!%p14_p13) target bundleno = 6 (0x6), region = 126 }
 0x260   :  { %942 = vsyncpa [#allocation5], 1 }
 0x261   :  { %944 = vsyncpa [#allocation5 + $0x1], 1 }

</bundles_post_ra>
